<compile_context>
chip_gen: v6e
topology: v6e:2x2x1
jax: 0.10.0
libtpu: 0.0.40
codegen_flags: <defaults>
</compile_context>

<pallas_src>
import functools

import numpy as np
import jax
import jax.numpy as jnp
from jax.experimental import pallas as pl
from jax.experimental.pallas import tpu as pltpu

KH = KW = 3
EPS = 1e-5


def residual_block_kernel(x_ref, wd_ref, w2_ref, wp_ref,
                          g1_ref, b1_ref, g2_ref, b2_ref, out_ref,
                          *, width, pad):
    # x_ref  : (N, Cout, pad + H*W + pad)  channel-replicated, flat-halo-padded input
    #          x_ref[n, oc, pad + q] = x[n, oc // (Cout//Cin), q],   zeros in the halo
    # wd_ref : (9, Cout, 1)   grouped 3x3 weights, one (Cout,1) column per tap
    # w2_ref : (Cout, Cout)   dense 1x1 conv weights, [out, in]
    # wp_ref : (Cout, 1)      grouped 1x1 projection weights
    # g*/b*  : (Cout, 1)      BatchNorm affine params
    # out_ref: (N, Cout, H*W) lane-dense output slab (H*W is a multiple of 128)
    N, C, HW = out_ref.shape

    # Column index of each flat spatial position (only the x-direction edge taps need a
    # mask; the y-direction edges read zeros from the flat halo padding).
    px = jax.lax.broadcasted_iota(jnp.int32, (1, 1, HW), 2) % width

    # ---- grouped 3x3 'same' conv: each output channel reads exactly one input channel,
    #      so it is 9 broadcast-scalar FMAs over the lane-dense slab.  Shifted tap
    #      windows are static slices of the padded ref (no materialized copies).
    acc = jnp.zeros((N, C, HW), jnp.float32)
    for dx in range(KW):
        ox = dx - 1
        col = jnp.zeros((N, C, HW), jnp.float32)
        for dy in range(KH):
            off = pad + (dy - 1) * width + ox
            xs = x_ref[:, :, off:off + HW]             # (N, C, HW) shifted window
            col = col + xs * wd_ref[dy * KW + dx]      # per-channel tap weight FMA
        if ox != 0:                                    # kill contributions that crossed a row edge
            col = jnp.where((px + ox >= 0) & (px + ox < width), col, 0.0)
        acc = acc + col

    # ---- BatchNorm (training-mode batch stats over (N,H,W)) folded into one FMA + ReLU
    def bn_relu(y, g, b):
        cnt = float(y.shape[0] * y.shape[2])
        mean = jnp.sum(jnp.sum(y, axis=2, keepdims=True), axis=0, keepdims=True) / cnt
        d = y - mean
        var = jnp.sum(jnp.sum(d * d, axis=2, keepdims=True), axis=0, keepdims=True) / cnt
        scale = g * jax.lax.rsqrt(var + EPS)           # (1, C, 1)
        shift = b - mean * scale
        return jnp.maximum(y * scale + shift, 0.0)

    h = bn_relu(acc, g1_ref[...], b1_ref[...])

    # ---- dense 1x1 conv (Cout x Cout channel mix): 8 broadcast FMAs on the VPU.
    w2 = w2_ref[...]
    h2 = jnp.zeros((N, C, HW), jnp.float32)
    for c in range(C):
        h2 = h2 + h[:, c:c + 1, :] * w2[:, c:c + 1]

    h2 = bn_relu(h2, g2_ref[...], b2_ref[...])

    # ---- grouped 1x1 projection of the residual path + add (one more broadcast FMA)
    x_res = x_ref[:, :, pad:pad + HW]
    out = h2 + x_res * wp_ref[...]

    out_ref[...] = out.astype(out_ref.dtype)


def residual_block(x_nchw, wd, w2m, wpm, g1, b1, g2, b2):
    """x_nchw: (N, Cin, H, W) float32 (PyTorch layout). Returns (N, Cout, H, W)."""
    N, Cin, H, W = x_nchw.shape
    Cout = w2m.shape[0]
    m = Cout // Cin
    HW = H * W
    PAD = W + 1
    HWP = HW + 2 * PAD

    # NCHW already has the flattened spatial dim contiguous, so the lane-major kernel
    # layout (N, C, H*W) needs no transpose: reshape + channel replication (groups
    # trick) + a small flat halo pad.  All of this fuses into building the single
    # kernel operand; no NHWC transpose or 2-D spatial pad round trip.
    x_flat = x_nchw.reshape(N, Cin, HW).astype(jnp.float32)
    x_rep = jnp.repeat(x_flat, m, axis=1)                    # channel oc reads oc // m
    x_pad = jnp.pad(x_rep, ((0, 0), (0, 0), (PAD, PAD)))     # flat halo for the 9 taps

    kernel = functools.partial(residual_block_kernel, width=W, pad=PAD)

    def full(shape):
        return pl.BlockSpec(shape, lambda i, _s=shape: (0,) * len(_s))

    out = pl.pallas_call(
        kernel,
        out_shape=jax.ShapeDtypeStruct((N, Cout, HW), x_nchw.dtype),
        grid_spec=pltpu.PrefetchScalarGridSpec(
            num_scalar_prefetch=0,
            grid=(1,),
            in_specs=[full((N, Cout, HWP)),
                      full((KH * KW, Cout, 1)),
                      full((Cout, Cout)),
                      full((Cout, 1)),
                      full((Cout, 1)), full((Cout, 1)),
                      full((Cout, 1)), full((Cout, 1))],
            out_specs=full((N, Cout, HW)),
        ),
        compiler_params=pltpu.CompilerParams(
            dimension_semantics=("arbitrary",)),
    )(x_pad, wd, w2m, wpm, g1, b1, g2, b2)

    return out.reshape(N, Cout, H, W)


# ---------------- parameter packing (glue, plain numpy) ----------------

def pack_grouped_3x3(w1):
    # PyTorch Conv2d(cin, cout, 3, groups=cin) weight: (cout, 1, 3, 3)
    # -> (9, cout, 1): one per-output-channel weight column per tap (tap = dy*3+dx).
    w = np.asarray(w1, np.float32).reshape(w1.shape[0], KH * KW)
    return jnp.asarray(np.transpose(w)[:, :, None])


def pack_grouped_1x1(wp):
    # PyTorch Conv2d(cin, cout, 1, groups=cin) weight: (cout, 1, 1, 1) -> (cout, 1)
    return jnp.asarray(np.asarray(wp, np.float32).reshape(-1, 1))


# ---------------- pure-JAX reference (correctness check) ----------------

def ref_forward(x, w1, w2, wp, g1, b1, g2, b2, cin):
    def bn(y, g, b):
        mean = jnp.mean(y, axis=(0, 2, 3), keepdims=True)
        var = jnp.mean(jnp.square(y - mean), axis=(0, 2, 3), keepdims=True)
        return ((y - mean) * jax.lax.rsqrt(var + EPS)
                * g.reshape(1, -1, 1, 1) + b.reshape(1, -1, 1, 1))

    hi = jax.lax.Precision.HIGHEST
    dims = ('NCHW', 'OIHW', 'NCHW')
    dn1 = jax.lax.conv_dimension_numbers(x.shape, w1.shape, dims)
    y = jax.lax.conv_general_dilated(x, w1, (1, 1), 'SAME', dimension_numbers=dn1,
                                     feature_group_count=cin, precision=hi)
    y = jnp.maximum(bn(y, g1, b1), 0.0)
    dn2 = jax.lax.conv_dimension_numbers(y.shape, w2.shape, dims)
    y = jax.lax.conv_general_dilated(y, w2, (1, 1), 'VALID',
                                     dimension_numbers=dn2, precision=hi)
    y = jnp.maximum(bn(y, g2, b2), 0.0)
    dnp = jax.lax.conv_dimension_numbers(x.shape, wp.shape, dims)
    p = jax.lax.conv_general_dilated(x, wp, (1, 1), 'VALID', dimension_numbers=dnp,
                                     feature_group_count=cin, precision=hi)
    return y + p


if __name__ == "__main__":
    N, Cin, Cout, H, W = 2, 4, 8, 16, 16

    key = jax.random.PRNGKey(0)
    kx, kp = jax.random.split(key)
    keys = jax.random.split(kp, 7)

    x = jax.random.normal(kx, (N, Cin, H, W), jnp.float32)

    # deterministic synthetic parameters (shapes from the module's __init__)
    w1 = 0.3 * jax.random.normal(keys[0], (Cout, 1, KH, KW), jnp.float32)   # grouped 3x3
    w2 = 0.3 * jax.random.normal(keys[1], (Cout, Cout, 1, 1), jnp.float32)  # dense 1x1
    wp = 0.3 * jax.random.normal(keys[2], (Cout, 1, 1, 1), jnp.float32)     # grouped 1x1 proj
    g1 = 1.0 + 0.1 * jax.random.normal(keys[3], (Cout,), jnp.float32)
    b1 = 0.1 * jax.random.normal(keys[4], (Cout,), jnp.float32)
    g2 = 1.0 + 0.1 * jax.random.normal(keys[5], (Cout,), jnp.float32)
    b2 = 0.1 * jax.random.normal(keys[6], (Cout,), jnp.float32)

    wd = pack_grouped_3x3(w1)
    w2m = jnp.asarray(np.asarray(w2)[:, :, 0, 0])            # (Cout_out, Cout_in)
    wpm = pack_grouped_1x1(wp)

    out = residual_block(x, wd, w2m, wpm,
                         g1.reshape(Cout, 1), b1.reshape(Cout, 1),
                         g2.reshape(Cout, 1), b2.reshape(Cout, 1))
    out = jax.block_until_ready(out)

    ref = ref_forward(x, w1, w2, wp, g1, b1, g2, b2, Cin)
    np.testing.assert_allclose(np.asarray(out), np.asarray(ref), rtol=2e-4, atol=2e-4)

    print("KERNEL_OK")
</pallas_src>

<mosaic_0001>
module attributes {stable_mosaic.version = 11 : i64} {
  func.func @residual_block_kernel(%arg0: i32, %arg1: memref<2x8x290xf32, #tpu.memory_space<vmem>>, %arg2: memref<9x8x1xf32, #tpu.memory_space<vmem>>, %arg3: memref<8x8xf32, #tpu.memory_space<vmem>>, %arg4: memref<8x1xf32, #tpu.memory_space<vmem>>, %arg5: memref<8x1xf32, #tpu.memory_space<vmem>>, %arg6: memref<8x1xf32, #tpu.memory_space<vmem>>, %arg7: memref<8x1xf32, #tpu.memory_space<vmem>>, %arg8: memref<8x1xf32, #tpu.memory_space<vmem>>, %arg9: memref<2x8x256xf32, #tpu.memory_space<vmem>>) attributes {dimension_semantics = [#tpu.dimension_semantics<arbitrary>], iteration_bounds = array<i64: 1>, scalar_prefetch = 0 : i64, scratch_operands = 0 : i64, tpu.core_type = #tpu.core_type<tc>, window_params = [{pipeline_mode = #tpu.pipeline_mode<synchronous>, transform_indices = @transform_0, window_bounds = array<i64: 2, 8, 290>}, {pipeline_mode = #tpu.pipeline_mode<synchronous>, transform_indices = @transform_1, window_bounds = array<i64: 9, 8, 1>}, {pipeline_mode = #tpu.pipeline_mode<synchronous>, transform_indices = @transform_2, window_bounds = array<i64: 8, 8>}, {pipeline_mode = #tpu.pipeline_mode<synchronous>, transform_indices = @transform_3, window_bounds = array<i64: 8, 1>}, {pipeline_mode = #tpu.pipeline_mode<synchronous>, transform_indices = @transform_4, window_bounds = array<i64: 8, 1>}, {pipeline_mode = #tpu.pipeline_mode<synchronous>, transform_indices = @transform_5, window_bounds = array<i64: 8, 1>}, {pipeline_mode = #tpu.pipeline_mode<synchronous>, transform_indices = @transform_6, window_bounds = array<i64: 8, 1>}, {pipeline_mode = #tpu.pipeline_mode<synchronous>, transform_indices = @transform_7, window_bounds = array<i64: 8, 1>}, {pipeline_mode = #tpu.pipeline_mode<synchronous>, transform_indices = @transform_8, window_bounds = array<i64: 2, 8, 256>}]} {
    %0 = tpu.iota {dimensions = array<i32: 2>} : vector<1x1x256xi32>
    %c16_i32 = arith.constant 16 : i32
    %c0_i32 = arith.constant 0 : i32
    %1 = arith.cmpi eq, %c16_i32, %c0_i32 : i32
    %c1_i32 = arith.constant 1 : i32
    %2 = arith.select %1, %c1_i32, %c16_i32 : i32
    %3 = vector.broadcast %2 : i32 to vector<1x1x256xi32>
    %4 = arith.remsi %0, %3 : vector<1x1x256xi32>
    %c0_i32_0 = arith.constant 0 : i32
    %5 = vector.broadcast %c0_i32_0 : i32 to vector<1x1x256xi32>
    %6 = arith.cmpi ne, %4, %5 : vector<1x1x256xi32>
    %c0_i32_1 = arith.constant 0 : i32
    %7 = vector.broadcast %c0_i32_1 : i32 to vector<1x1x256xi32>
    %8 = arith.cmpi slt, %4, %7 : vector<1x1x256xi32>
    %c0_i32_2 = arith.constant 0 : i32
    %9 = arith.cmpi slt, %2, %c0_i32_2 : i32
    %10 = vector.broadcast %9 : i1 to vector<1x1x256xi1>
    %11 = vector.broadcast %10 : vector<1x1x256xi1> to vector<1x1x256xi1>
    %12 = arith.xori %8, %11 : vector<1x1x256xi1>
    %13 = arith.andi %12, %6 : vector<1x1x256xi1>
    %14 = vector.broadcast %2 : i32 to vector<1x1x256xi32>
    %15 = arith.addi %4, %14 : vector<1x1x256xi32>
    %16 = arith.select %13, %15, %4 : vector<1x1x256xi1>, vector<1x1x256xi32>
    %cst = arith.constant 0.000000e+00 : f32
    %17 = vector.broadcast %cst : f32 to vector<2x8x256xf32>
    %cst_3 = arith.constant 0.000000e+00 : f32
    %18 = vector.broadcast %cst_3 : f32 to vector<2x8x256xf32>
    %c0 = arith.constant 0 : index
    %c0_4 = arith.constant 0 : index
    %c0_5 = arith.constant 0 : index
    %19 = vector.load %arg1[%c0, %c0_4, %c0_5] : memref<2x8x290xf32, #tpu.memory_space<vmem>>, vector<2x8x256xf32>
    %c0_6 = arith.constant 0 : index
    %c0_7 = arith.constant 0 : index
    %c0_8 = arith.constant 0 : index
    %20 = vector.load %arg2[%c0_6, %c0_7, %c0_8] : memref<9x8x1xf32, #tpu.memory_space<vmem>>, vector<1x8x1xf32>
    %21 = vector.shape_cast %20 : vector<1x8x1xf32> to vector<8x1xf32>
    %22 = vector.shape_cast %21 : vector<8x1xf32> to vector<1x8x1xf32>
    %23 = vector.broadcast %22 : vector<1x8x1xf32> to vector<2x8x256xf32>
    %24 = arith.mulf %19, %23 : vector<2x8x256xf32>
    %25 = arith.addf %18, %24 : vector<2x8x256xf32>
    %c0_9 = arith.constant 0 : index
    %c0_10 = arith.constant 0 : index
    %c16 = arith.constant 16 : index
    %26 = vector.load %arg1[%c0_9, %c0_10, %c16] : memref<2x8x290xf32, #tpu.memory_space<vmem>>, vector<2x8x256xf32>
    %c3 = arith.constant 3 : index
    %c0_11 = arith.constant 0 : index
    %c0_12 = arith.constant 0 : index
    %27 = vector.load %arg2[%c3, %c0_11, %c0_12] : memref<9x8x1xf32, #tpu.memory_space<vmem>>, vector<1x8x1xf32>
    %28 = vector.shape_cast %27 : vector<1x8x1xf32> to vector<8x1xf32>
    %29 = vector.shape_cast %28 : vector<8x1xf32> to vector<1x8x1xf32>
    %30 = vector.broadcast %29 : vector<1x8x1xf32> to vector<2x8x256xf32>
    %31 = arith.mulf %26, %30 : vector<2x8x256xf32>
    %32 = arith.addf %25, %31 : vector<2x8x256xf32>
    %c0_13 = arith.constant 0 : index
    %c0_14 = arith.constant 0 : index
    %c32 = arith.constant 32 : index
    %33 = vector.load %arg1[%c0_13, %c0_14, %c32] : memref<2x8x290xf32, #tpu.memory_space<vmem>>, vector<2x8x256xf32>
    %c6 = arith.constant 6 : index
    %c0_15 = arith.constant 0 : index
    %c0_16 = arith.constant 0 : index
    %34 = vector.load %arg2[%c6, %c0_15, %c0_16] : memref<9x8x1xf32, #tpu.memory_space<vmem>>, vector<1x8x1xf32>
    %35 = vector.shape_cast %34 : vector<1x8x1xf32> to vector<8x1xf32>
    %36 = vector.shape_cast %35 : vector<8x1xf32> to vector<1x8x1xf32>
    %37 = vector.broadcast %36 : vector<1x8x1xf32> to vector<2x8x256xf32>
    %38 = arith.mulf %33, %37 : vector<2x8x256xf32>
    %39 = arith.addf %32, %38 : vector<2x8x256xf32>
    %c-1_i32 = arith.constant -1 : i32
    %40 = vector.broadcast %c-1_i32 : i32 to vector<1x1x256xi32>
    %41 = arith.addi %16, %40 : vector<1x1x256xi32>
    %c0_i32_17 = arith.constant 0 : i32
    %42 = vector.broadcast %c0_i32_17 : i32 to vector<1x1x256xi32>
    %43 = arith.cmpi sge, %41, %42 : vector<1x1x256xi32>
    %c-1_i32_18 = arith.constant -1 : i32
    %44 = vector.broadcast %c-1_i32_18 : i32 to vector<1x1x256xi32>
    %45 = arith.addi %16, %44 : vector<1x1x256xi32>
    %c16_i32_19 = arith.constant 16 : i32
    %46 = vector.broadcast %c16_i32_19 : i32 to vector<1x1x256xi32>
    %47 = arith.cmpi slt, %45, %46 : vector<1x1x256xi32>
    %48 = arith.andi %43, %47 : vector<1x1x256xi1>
    %cst_20 = arith.constant 0.000000e+00 : f32
    %49 = vector.shape_cast %48 : vector<1x1x256xi1> to vector<1x1x256xi1>
    %50 = vector.broadcast %49 : vector<1x1x256xi1> to vector<2x8x256xi1>
    %51 = vector.broadcast %cst_20 : f32 to vector<2x8x256xf32>
    %52 = arith.select %50, %39, %51 : vector<2x8x256xi1>, vector<2x8x256xf32>
    %53 = arith.addf %17, %52 : vector<2x8x256xf32>
    %cst_21 = arith.constant 0.000000e+00 : f32
    %54 = vector.broadcast %cst_21 : f32 to vector<2x8x256xf32>
    %c0_22 = arith.constant 0 : index
    %c0_23 = arith.constant 0 : index
    %c1 = arith.constant 1 : index
    %55 = vector.load %arg1[%c0_22, %c0_23, %c1] : memref<2x8x290xf32, #tpu.memory_space<vmem>>, vector<2x8x256xf32>
    %c1_24 = arith.constant 1 : index
    %c0_25 = arith.constant 0 : index
    %c0_26 = arith.constant 0 : index
    %56 = vector.load %arg2[%c1_24, %c0_25, %c0_26] : memref<9x8x1xf32, #tpu.memory_space<vmem>>, vector<1x8x1xf32>
    %57 = vector.shape_cast %56 : vector<1x8x1xf32> to vector<8x1xf32>
    %58 = vector.shape_cast %57 : vector<8x1xf32> to vector<1x8x1xf32>
    %59 = vector.broadcast %58 : vector<1x8x1xf32> to vector<2x8x256xf32>
    %60 = arith.mulf %55, %59 : vector<2x8x256xf32>
    %61 = arith.addf %54, %60 : vector<2x8x256xf32>
    %c0_27 = arith.constant 0 : index
    %c0_28 = arith.constant 0 : index
    %c17 = arith.constant 17 : index
    %62 = vector.load %arg1[%c0_27, %c0_28, %c17] : memref<2x8x290xf32, #tpu.memory_space<vmem>>, vector<2x8x256xf32>
    %c4 = arith.constant 4 : index
    %c0_29 = arith.constant 0 : index
    %c0_30 = arith.constant 0 : index
    %63 = vector.load %arg2[%c4, %c0_29, %c0_30] : memref<9x8x1xf32, #tpu.memory_space<vmem>>, vector<1x8x1xf32>
    %64 = vector.shape_cast %63 : vector<1x8x1xf32> to vector<8x1xf32>
    %65 = vector.shape_cast %64 : vector<8x1xf32> to vector<1x8x1xf32>
    %66 = vector.broadcast %65 : vector<1x8x1xf32> to vector<2x8x256xf32>
    %67 = arith.mulf %62, %66 : vector<2x8x256xf32>
    %68 = arith.addf %61, %67 : vector<2x8x256xf32>
    %c0_31 = arith.constant 0 : index
    %c0_32 = arith.constant 0 : index
    %c33 = arith.constant 33 : index
    %69 = vector.load %arg1[%c0_31, %c0_32, %c33] : memref<2x8x290xf32, #tpu.memory_space<vmem>>, vector<2x8x256xf32>
    %c7 = arith.constant 7 : index
    %c0_33 = arith.constant 0 : index
    %c0_34 = arith.constant 0 : index
    %70 = vector.load %arg2[%c7, %c0_33, %c0_34] : memref<9x8x1xf32, #tpu.memory_space<vmem>>, vector<1x8x1xf32>
    %71 = vector.shape_cast %70 : vector<1x8x1xf32> to vector<8x1xf32>
    %72 = vector.shape_cast %71 : vector<8x1xf32> to vector<1x8x1xf32>
    %73 = vector.broadcast %72 : vector<1x8x1xf32> to vector<2x8x256xf32>
    %74 = arith.mulf %69, %73 : vector<2x8x256xf32>
    %75 = arith.addf %68, %74 : vector<2x8x256xf32>
    %76 = arith.addf %53, %75 : vector<2x8x256xf32>
    %cst_35 = arith.constant 0.000000e+00 : f32
    %77 = vector.broadcast %cst_35 : f32 to vector<2x8x256xf32>
    %c0_36 = arith.constant 0 : index
    %c0_37 = arith.constant 0 : index
    %c2 = arith.constant 2 : index
    %78 = vector.load %arg1[%c0_36, %c0_37, %c2] : memref<2x8x290xf32, #tpu.memory_space<vmem>>, vector<2x8x256xf32>
    %c2_38 = arith.constant 2 : index
    %c0_39 = arith.constant 0 : index
    %c0_40 = arith.constant 0 : index
    %79 = vector.load %arg2[%c2_38, %c0_39, %c0_40] : memref<9x8x1xf32, #tpu.memory_space<vmem>>, vector<1x8x1xf32>
    %80 = vector.shape_cast %79 : vector<1x8x1xf32> to vector<8x1xf32>
    %81 = vector.shape_cast %80 : vector<8x1xf32> to vector<1x8x1xf32>
    %82 = vector.broadcast %81 : vector<1x8x1xf32> to vector<2x8x256xf32>
    %83 = arith.mulf %78, %82 : vector<2x8x256xf32>
    %84 = arith.addf %77, %83 : vector<2x8x256xf32>
    %c0_41 = arith.constant 0 : index
    %c0_42 = arith.constant 0 : index
    %c18 = arith.constant 18 : index
    %85 = vector.load %arg1[%c0_41, %c0_42, %c18] : memref<2x8x290xf32, #tpu.memory_space<vmem>>, vector<2x8x256xf32>
    %c5 = arith.constant 5 : index
    %c0_43 = arith.constant 0 : index
    %c0_44 = arith.constant 0 : index
    %86 = vector.load %arg2[%c5, %c0_43, %c0_44] : memref<9x8x1xf32, #tpu.memory_space<vmem>>, vector<1x8x1xf32>
    %87 = vector.shape_cast %86 : vector<1x8x1xf32> to vector<8x1xf32>
    %88 = vector.shape_cast %87 : vector<8x1xf32> to vector<1x8x1xf32>
    %89 = vector.broadcast %88 : vector<1x8x1xf32> to vector<2x8x256xf32>
    %90 = arith.mulf %85, %89 : vector<2x8x256xf32>
    %91 = arith.addf %84, %90 : vector<2x8x256xf32>
    %c0_45 = arith.constant 0 : index
    %c0_46 = arith.constant 0 : index
    %c34 = arith.constant 34 : index
    %92 = vector.load %arg1[%c0_45, %c0_46, %c34] : memref<2x8x290xf32, #tpu.memory_space<vmem>>, vector<2x8x256xf32>
    %c8 = arith.constant 8 : index
    %c0_47 = arith.constant 0 : index
    %c0_48 = arith.constant 0 : index
    %93 = vector.load %arg2[%c8, %c0_47, %c0_48] : memref<9x8x1xf32, #tpu.memory_space<vmem>>, vector<1x8x1xf32>
    %94 = vector.shape_cast %93 : vector<1x8x1xf32> to vector<8x1xf32>
    %95 = vector.shape_cast %94 : vector<8x1xf32> to vector<1x8x1xf32>
    %96 = vector.broadcast %95 : vector<1x8x1xf32> to vector<2x8x256xf32>
    %97 = arith.mulf %92, %96 : vector<2x8x256xf32>
    %98 = arith.addf %91, %97 : vector<2x8x256xf32>
    %c1_i32_49 = arith.constant 1 : i32
    %99 = vector.broadcast %c1_i32_49 : i32 to vector<1x1x256xi32>
    %100 = arith.addi %16, %99 : vector<1x1x256xi32>
    %c0_i32_50 = arith.constant 0 : i32
    %101 = vector.broadcast %c0_i32_50 : i32 to vector<1x1x256xi32>
    %102 = arith.cmpi sge, %100, %101 : vector<1x1x256xi32>
    %c1_i32_51 = arith.constant 1 : i32
    %103 = vector.broadcast %c1_i32_51 : i32 to vector<1x1x256xi32>
    %104 = arith.addi %16, %103 : vector<1x1x256xi32>
    %c16_i32_52 = arith.constant 16 : i32
    %105 = vector.broadcast %c16_i32_52 : i32 to vector<1x1x256xi32>
    %106 = arith.cmpi slt, %104, %105 : vector<1x1x256xi32>
    %107 = arith.andi %102, %106 : vector<1x1x256xi1>
    %cst_53 = arith.constant 0.000000e+00 : f32
    %108 = vector.shape_cast %107 : vector<1x1x256xi1> to vector<1x1x256xi1>
    %109 = vector.broadcast %108 : vector<1x1x256xi1> to vector<2x8x256xi1>
    %110 = vector.broadcast %cst_53 : f32 to vector<2x8x256xf32>
    %111 = arith.select %109, %98, %110 : vector<2x8x256xi1>, vector<2x8x256xf32>
    %112 = arith.addf %76, %111 : vector<2x8x256xf32>
    %c0_54 = arith.constant 0 : index
    %c0_55 = arith.constant 0 : index
    %113 = vector.load %arg5[%c0_54, %c0_55] : memref<8x1xf32, #tpu.memory_space<vmem>>, vector<8x1xf32>
    %c0_56 = arith.constant 0 : index
    %c0_57 = arith.constant 0 : index
    %114 = vector.load %arg6[%c0_56, %c0_57] : memref<8x1xf32, #tpu.memory_space<vmem>>, vector<8x1xf32>
    %cst_58 = arith.constant dense<0.000000e+00> : vector<2x8xf32>
    %115 = vector.multi_reduction <add>, %112, %cst_58 [2] : vector<2x8x256xf32> to vector<2x8xf32>
    %116 = vector.shape_cast %115 : vector<2x8xf32> to vector<2x8x1xf32>
    %cst_59 = arith.constant dense<0.000000e+00> : vector<8x1xf32>
    %117 = vector.multi_reduction <add>, %116, %cst_59 [0] : vector<2x8x1xf32> to vector<8x1xf32>
    %118 = vector.shape_cast %117 : vector<8x1xf32> to vector<1x8x1xf32>
    %cst_60 = arith.constant 5.120000e+02 : f32
    %119 = vector.broadcast %cst_60 : f32 to vector<1x8x1xf32>
    %120 = arith.divf %118, %119 : vector<1x8x1xf32>
    %121 = vector.broadcast %120 : vector<1x8x1xf32> to vector<2x8x256xf32>
    %122 = arith.subf %112, %121 : vector<2x8x256xf32>
    %123 = arith.mulf %122, %122 : vector<2x8x256xf32>
    %cst_61 = arith.constant dense<0.000000e+00> : vector<2x8xf32>
    %124 = vector.multi_reduction <add>, %123, %cst_61 [2] : vector<2x8x256xf32> to vector<2x8xf32>
    %125 = vector.shape_cast %124 : vector<2x8xf32> to vector<2x8x1xf32>
    %cst_62 = arith.constant dense<0.000000e+00> : vector<8x1xf32>
    %126 = vector.multi_reduction <add>, %125, %cst_62 [0] : vector<2x8x1xf32> to vector<8x1xf32>
    %127 = vector.shape_cast %126 : vector<8x1xf32> to vector<1x8x1xf32>
    %cst_63 = arith.constant 5.120000e+02 : f32
    %128 = vector.broadcast %cst_63 : f32 to vector<1x8x1xf32>
    %129 = arith.divf %127, %128 : vector<1x8x1xf32>
    %cst_64 = arith.constant 9.99999974E-6 : f32
    %130 = vector.broadcast %cst_64 : f32 to vector<1x8x1xf32>
    %131 = arith.addf %129, %130 : vector<1x8x1xf32>
    %132 = math.rsqrt %131 : vector<1x8x1xf32>
    %133 = vector.shape_cast %113 : vector<8x1xf32> to vector<1x8x1xf32>
    %134 = arith.mulf %133, %132 : vector<1x8x1xf32>
    %135 = arith.mulf %120, %134 : vector<1x8x1xf32>
    %136 = vector.shape_cast %114 : vector<8x1xf32> to vector<1x8x1xf32>
    %137 = arith.subf %136, %135 : vector<1x8x1xf32>
    %138 = vector.broadcast %134 : vector<1x8x1xf32> to vector<2x8x256xf32>
    %139 = arith.mulf %112, %138 : vector<2x8x256xf32>
    %140 = vector.broadcast %137 : vector<1x8x1xf32> to vector<2x8x256xf32>
    %141 = arith.addf %139, %140 : vector<2x8x256xf32>
    %cst_65 = arith.constant 0.000000e+00 : f32
    %142 = vector.broadcast %cst_65 : f32 to vector<2x8x256xf32>
    %143 = arith.maximumf %141, %142 : vector<2x8x256xf32>
    %c0_66 = arith.constant 0 : index
    %c0_67 = arith.constant 0 : index
    %144 = vector.load %arg3[%c0_66, %c0_67] : memref<8x8xf32, #tpu.memory_space<vmem>>, vector<8x8xf32>
    %cst_68 = arith.constant 0.000000e+00 : f32
    %145 = vector.broadcast %cst_68 : f32 to vector<2x8x256xf32>
    %146 = vector.extract_strided_slice %143 {offsets = [0, 0, 0], sizes = [2, 1, 256], strides = [1, 1, 1]} : vector<2x8x256xf32> to vector<2x1x256xf32>
    %147 = vector.extract_strided_slice %144 {offsets = [0, 0], sizes = [8, 1], strides = [1, 1]} : vector<8x8xf32> to vector<8x1xf32>
    %148 = vector.shape_cast %147 : vector<8x1xf32> to vector<1x8x1xf32>
    %149 = vector.broadcast %146 : vector<2x1x256xf32> to vector<2x8x256xf32>
    %150 = vector.broadcast %148 : vector<1x8x1xf32> to vector<2x8x256xf32>
    %151 = arith.mulf %149, %150 : vector<2x8x256xf32>
    %152 = arith.addf %145, %151 : vector<2x8x256xf32>
    %153 = vector.extract_strided_slice %143 {offsets = [0, 1, 0], sizes = [2, 1, 256], strides = [1, 1, 1]} : vector<2x8x256xf32> to vector<2x1x256xf32>
    %154 = vector.extract_strided_slice %144 {offsets = [0, 1], sizes = [8, 1], strides = [1, 1]} : vector<8x8xf32> to vector<8x1xf32>
    %155 = vector.shape_cast %154 : vector<8x1xf32> to vector<1x8x1xf32>
    %156 = vector.broadcast %153 : vector<2x1x256xf32> to vector<2x8x256xf32>
    %157 = vector.broadcast %155 : vector<1x8x1xf32> to vector<2x8x256xf32>
    %158 = arith.mulf %156, %157 : vector<2x8x256xf32>
    %159 = arith.addf %152, %158 : vector<2x8x256xf32>
    %160 = vector.extract_strided_slice %143 {offsets = [0, 2, 0], sizes = [2, 1, 256], strides = [1, 1, 1]} : vector<2x8x256xf32> to vector<2x1x256xf32>
    %161 = vector.extract_strided_slice %144 {offsets = [0, 2], sizes = [8, 1], strides = [1, 1]} : vector<8x8xf32> to vector<8x1xf32>
    %162 = vector.shape_cast %161 : vector<8x1xf32> to vector<1x8x1xf32>
    %163 = vector.broadcast %160 : vector<2x1x256xf32> to vector<2x8x256xf32>
    %164 = vector.broadcast %162 : vector<1x8x1xf32> to vector<2x8x256xf32>
    %165 = arith.mulf %163, %164 : vector<2x8x256xf32>
    %166 = arith.addf %159, %165 : vector<2x8x256xf32>
    %167 = vector.extract_strided_slice %143 {offsets = [0, 3, 0], sizes = [2, 1, 256], strides = [1, 1, 1]} : vector<2x8x256xf32> to vector<2x1x256xf32>
    %168 = vector.extract_strided_slice %144 {offsets = [0, 3], sizes = [8, 1], strides = [1, 1]} : vector<8x8xf32> to vector<8x1xf32>
    %169 = vector.shape_cast %168 : vector<8x1xf32> to vector<1x8x1xf32>
    %170 = vector.broadcast %167 : vector<2x1x256xf32> to vector<2x8x256xf32>
    %171 = vector.broadcast %169 : vector<1x8x1xf32> to vector<2x8x256xf32>
    %172 = arith.mulf %170, %171 : vector<2x8x256xf32>
    %173 = arith.addf %166, %172 : vector<2x8x256xf32>
    %174 = vector.extract_strided_slice %143 {offsets = [0, 4, 0], sizes = [2, 1, 256], strides = [1, 1, 1]} : vector<2x8x256xf32> to vector<2x1x256xf32>
    %175 = vector.extract_strided_slice %144 {offsets = [0, 4], sizes = [8, 1], strides = [1, 1]} : vector<8x8xf32> to vector<8x1xf32>
    %176 = vector.shape_cast %175 : vector<8x1xf32> to vector<1x8x1xf32>
    %177 = vector.broadcast %174 : vector<2x1x256xf32> to vector<2x8x256xf32>
    %178 = vector.broadcast %176 : vector<1x8x1xf32> to vector<2x8x256xf32>
    %179 = arith.mulf %177, %178 : vector<2x8x256xf32>
    %180 = arith.addf %173, %179 : vector<2x8x256xf32>
    %181 = vector.extract_strided_slice %143 {offsets = [0, 5, 0], sizes = [2, 1, 256], strides = [1, 1, 1]} : vector<2x8x256xf32> to vector<2x1x256xf32>
    %182 = vector.extract_strided_slice %144 {offsets = [0, 5], sizes = [8, 1], strides = [1, 1]} : vector<8x8xf32> to vector<8x1xf32>
    %183 = vector.shape_cast %182 : vector<8x1xf32> to vector<1x8x1xf32>
    %184 = vector.broadcast %181 : vector<2x1x256xf32> to vector<2x8x256xf32>
    %185 = vector.broadcast %183 : vector<1x8x1xf32> to vector<2x8x256xf32>
    %186 = arith.mulf %184, %185 : vector<2x8x256xf32>
    %187 = arith.addf %180, %186 : vector<2x8x256xf32>
    %188 = vector.extract_strided_slice %143 {offsets = [0, 6, 0], sizes = [2, 1, 256], strides = [1, 1, 1]} : vector<2x8x256xf32> to vector<2x1x256xf32>
    %189 = vector.extract_strided_slice %144 {offsets = [0, 6], sizes = [8, 1], strides = [1, 1]} : vector<8x8xf32> to vector<8x1xf32>
    %190 = vector.shape_cast %189 : vector<8x1xf32> to vector<1x8x1xf32>
    %191 = vector.broadcast %188 : vector<2x1x256xf32> to vector<2x8x256xf32>
    %192 = vector.broadcast %190 : vector<1x8x1xf32> to vector<2x8x256xf32>
    %193 = arith.mulf %191, %192 : vector<2x8x256xf32>
    %194 = arith.addf %187, %193 : vector<2x8x256xf32>
    %195 = vector.extract_strided_slice %143 {offsets = [0, 7, 0], sizes = [2, 1, 256], strides = [1, 1, 1]} : vector<2x8x256xf32> to vector<2x1x256xf32>
    %196 = vector.extract_strided_slice %144 {offsets = [0, 7], sizes = [8, 1], strides = [1, 1]} : vector<8x8xf32> to vector<8x1xf32>
    %197 = vector.shape_cast %196 : vector<8x1xf32> to vector<1x8x1xf32>
    %198 = vector.broadcast %195 : vector<2x1x256xf32> to vector<2x8x256xf32>
    %199 = vector.broadcast %197 : vector<1x8x1xf32> to vector<2x8x256xf32>
    %200 = arith.mulf %198, %199 : vector<2x8x256xf32>
    %201 = arith.addf %194, %200 : vector<2x8x256xf32>
    %c0_69 = arith.constant 0 : index
    %c0_70 = arith.constant 0 : index
    %202 = vector.load %arg7[%c0_69, %c0_70] : memref<8x1xf32, #tpu.memory_space<vmem>>, vector<8x1xf32>
    %c0_71 = arith.constant 0 : index
    %c0_72 = arith.constant 0 : index
    %203 = vector.load %arg8[%c0_71, %c0_72] : memref<8x1xf32, #tpu.memory_space<vmem>>, vector<8x1xf32>
    %cst_73 = arith.constant dense<0.000000e+00> : vector<2x8xf32>
    %204 = vector.multi_reduction <add>, %201, %cst_73 [2] : vector<2x8x256xf32> to vector<2x8xf32>
    %205 = vector.shape_cast %204 : vector<2x8xf32> to vector<2x8x1xf32>
    %cst_74 = arith.constant dense<0.000000e+00> : vector<8x1xf32>
    %206 = vector.multi_reduction <add>, %205, %cst_74 [0] : vector<2x8x1xf32> to vector<8x1xf32>
    %207 = vector.shape_cast %206 : vector<8x1xf32> to vector<1x8x1xf32>
    %cst_75 = arith.constant 5.120000e+02 : f32
    %208 = vector.broadcast %cst_75 : f32 to vector<1x8x1xf32>
    %209 = arith.divf %207, %208 : vector<1x8x1xf32>
    %210 = vector.broadcast %209 : vector<1x8x1xf32> to vector<2x8x256xf32>
    %211 = arith.subf %201, %210 : vector<2x8x256xf32>
    %212 = arith.mulf %211, %211 : vector<2x8x256xf32>
    %cst_76 = arith.constant dense<0.000000e+00> : vector<2x8xf32>
    %213 = vector.multi_reduction <add>, %212, %cst_76 [2] : vector<2x8x256xf32> to vector<2x8xf32>
    %214 = vector.shape_cast %213 : vector<2x8xf32> to vector<2x8x1xf32>
    %cst_77 = arith.constant dense<0.000000e+00> : vector<8x1xf32>
    %215 = vector.multi_reduction <add>, %214, %cst_77 [0] : vector<2x8x1xf32> to vector<8x1xf32>
    %216 = vector.shape_cast %215 : vector<8x1xf32> to vector<1x8x1xf32>
    %cst_78 = arith.constant 5.120000e+02 : f32
    %217 = vector.broadcast %cst_78 : f32 to vector<1x8x1xf32>
    %218 = arith.divf %216, %217 : vector<1x8x1xf32>
    %cst_79 = arith.constant 9.99999974E-6 : f32
    %219 = vector.broadcast %cst_79 : f32 to vector<1x8x1xf32>
    %220 = arith.addf %218, %219 : vector<1x8x1xf32>
    %221 = math.rsqrt %220 : vector<1x8x1xf32>
    %222 = vector.shape_cast %202 : vector<8x1xf32> to vector<1x8x1xf32>
    %223 = arith.mulf %222, %221 : vector<1x8x1xf32>
    %224 = arith.mulf %209, %223 : vector<1x8x1xf32>
    %225 = vector.shape_cast %203 : vector<8x1xf32> to vector<1x8x1xf32>
    %226 = arith.subf %225, %224 : vector<1x8x1xf32>
    %227 = vector.broadcast %223 : vector<1x8x1xf32> to vector<2x8x256xf32>
    %228 = arith.mulf %201, %227 : vector<2x8x256xf32>
    %229 = vector.broadcast %226 : vector<1x8x1xf32> to vector<2x8x256xf32>
    %230 = arith.addf %228, %229 : vector<2x8x256xf32>
    %cst_80 = arith.constant 0.000000e+00 : f32
    %231 = vector.broadcast %cst_80 : f32 to vector<2x8x256xf32>
    %232 = arith.maximumf %230, %231 : vector<2x8x256xf32>
    %c0_81 = arith.constant 0 : index
    %c0_82 = arith.constant 0 : index
    %c17_83 = arith.constant 17 : index
    %233 = vector.load %arg1[%c0_81, %c0_82, %c17_83] : memref<2x8x290xf32, #tpu.memory_space<vmem>>, vector<2x8x256xf32>
    %c0_84 = arith.constant 0 : index
    %c0_85 = arith.constant 0 : index
    %234 = vector.load %arg4[%c0_84, %c0_85] : memref<8x1xf32, #tpu.memory_space<vmem>>, vector<8x1xf32>
    %235 = vector.shape_cast %234 : vector<8x1xf32> to vector<1x8x1xf32>
    %236 = vector.broadcast %235 : vector<1x8x1xf32> to vector<2x8x256xf32>
    %237 = arith.mulf %233, %236 : vector<2x8x256xf32>
    %238 = arith.addf %232, %237 : vector<2x8x256xf32>
    %c0_86 = arith.constant 0 : index
    %c0_87 = arith.constant 0 : index
    %c0_88 = arith.constant 0 : index
    %239 = vector.load %arg9[%c0_86, %c0_87, %c0_88] : memref<2x8x256xf32, #tpu.memory_space<vmem>>, vector<2x8x256xf32>
    tpu.vector_store %arg9[%c0_86, %c0_87, %c0_88], %238 {strides = array<i32>} : memref<2x8x256xf32, #tpu.memory_space<vmem>>, vector<2x8x256xf32>,
    return
  }
  func.func @transform_0(%arg0: i32) -> (i32, i32, i32) {
    %c0_i32 = arith.constant 0 : i32
    %c0_i32_0 = arith.constant 0 : i32
    %c0_i32_1 = arith.constant 0 : i32
    %c0_i32_2 = arith.constant 0 : i32
    return %c0_i32, %c0_i32_0, %c0_i32_1 : i32, i32, i32
  }
  func.func @transform_1(%arg0: i32) -> (i32, i32, i32) {
    %c0_i32 = arith.constant 0 : i32
    %c0_i32_0 = arith.constant 0 : i32
    %c0_i32_1 = arith.constant 0 : i32
    %c0_i32_2 = arith.constant 0 : i32
    return %c0_i32, %c0_i32_0, %c0_i32_1 : i32, i32, i32
  }
  func.func @transform_2(%arg0: i32) -> (i32, i32) {
    %c0_i32 = arith.constant 0 : i32
    %c0_i32_0 = arith.constant 0 : i32
    %c0_i32_1 = arith.constant 0 : i32
    return %c0_i32, %c0_i32_0 : i32, i32
  }
  func.func @transform_3(%arg0: i32) -> (i32, i32) {
    %c0_i32 = arith.constant 0 : i32
    %c0_i32_0 = arith.constant 0 : i32
    %c0_i32_1 = arith.constant 0 : i32
    return %c0_i32, %c0_i32_0 : i32, i32
  }
  func.func @transform_4(%arg0: i32) -> (i32, i32) {
    %c0_i32 = arith.constant 0 : i32
    %c0_i32_0 = arith.constant 0 : i32
    %c0_i32_1 = arith.constant 0 : i32
    return %c0_i32, %c0_i32_0 : i32, i32
  }
  func.func @transform_5(%arg0: i32) -> (i32, i32) {
    %c0_i32 = arith.constant 0 : i32
    %c0_i32_0 = arith.constant 0 : i32
    %c0_i32_1 = arith.constant 0 : i32
    return %c0_i32, %c0_i32_0 : i32, i32
  }
  func.func @transform_6(%arg0: i32) -> (i32, i32) {
    %c0_i32 = arith.constant 0 : i32
    %c0_i32_0 = arith.constant 0 : i32
    %c0_i32_1 = arith.constant 0 : i32
    return %c0_i32, %c0_i32_0 : i32, i32
  }
  func.func @transform_7(%arg0: i32) -> (i32, i32) {
    %c0_i32 = arith.constant 0 : i32
    %c0_i32_0 = arith.constant 0 : i32
    %c0_i32_1 = arith.constant 0 : i32
    return %c0_i32, %c0_i32_0 : i32, i32
  }
  func.func @transform_8(%arg0: i32) -> (i32, i32, i32) {
    %c0_i32 = arith.constant 0 : i32
    %c0_i32_0 = arith.constant 0 : i32
    %c0_i32_1 = arith.constant 0 : i32
    %c0_i32_2 = arith.constant 0 : i32
    return %c0_i32, %c0_i32_0, %c0_i32_1 : i32, i32, i32
  }
}

</mosaic_0001>

<bundles_post_ra>
// kernel: tpu_custom_call.1
= control target key start
LH: loop header
LB: loop body
LE: loop exit
PB: predicated region body
PF: predicated region fallthrough
CT: control target
= control target key end

     0   :  { %v950_v1 = vmov 0   ;;  %s1341_s0 = inlined_call_operand.vmem [shape: f32[2,8,290], index: 0, kind: input, shape index: {}]   ;;  %s1342_s1 = inlined_call_operand.vmem [shape: f32[9,8,1], index: 1, kind: input, shape index: {}]   ;;  %s1343_s2 = inlined_call_operand.vmem [shape: f32[8,8], index: 2, kind: input, shape index: {}]   ;;  %s1344_s3 = inlined_call_operand.vmem [shape: f32[8,1], index: 3, kind: input, shape index: {}]   ;;  %s1345_s4 = inlined_call_operand.vmem [shape: f32[8,1], index: 4, kind: input, shape index: {}]   ;;  %s1346_s5 = inlined_call_operand.vmem [shape: f32[8,1], index: 5, kind: input, shape index: {}]   ;;  %s1347_s6 = inlined_call_operand.vmem [shape: f32[8,1], index: 6, kind: input, shape index: {}]   ;;  %s1348_s7 = inlined_call_operand.vmem [shape: f32[8,1], index: 7, kind: input, shape index: {}]   ;;  %s1349_s8 = inlined_call_operand.hbm [shape: f32[2,8,256], index: 8, kind: output, shape index: {}]  }
   0x1   :  { %v892_v0 = vld [vmem:[%s1342_s1 + $0x20] sm:$0xff]  ;;  %913 = vset.pattern.permute.xlu0 %v950_v1  ;;  %914 = vset.pattern.permute.xlu1 %v950_v1  ;;  %v893_v2 = vld [vmem:[%s1342_s1 + $0x38] sm:$0xff]  ;;  %v895_v3 = vld [vmem:[%s1342_s1 + $0x28] sm:$0xff] }
   0x2   :  { %212 = vperm.xlu0 %913, %v892_v0   ;;  %259 = vperm.xlu1 %914, %v893_v2   ;;  %v896_v4 = vld [vmem:[%s1342_s1 + $0x40] sm:$0xff] }
   0x3   :  { %13 = vsyncpa [#allocation3], 0  ;;  %v889_v5 = vld [vmem:[%s1342_s1 + $0x18] sm:$0xff]  ;;  %v891_v6 = vld [vmem:[%s1342_s1 + $0x8] sm:$0xff]  ;;  %s951_s29 = smov 112   ;;  %vm112_vm0 = vcmask 916480  }
   0x4   :  { %v890_v7 = vld [vmem:[%s1342_s1 + $0x30] sm:$0xff]  ;;  %v1040_v9 = vld [vmem:[%s1341_s0 + $0x8] sm:$0xff]  ;;  %v1045_v10 = vld [vmem:[%s1341_s0] sm:$0xff]  ;;  %vm156_vm1 = vcmask 785408   ;;  %s954_s14 = smov 126   ;;  %vm476_vm4 = vcmask 1031168  }
   0x5   :  { %v894_v8 = vld [vmem:[%s1342_s1 + $0x10] sm:$0xff]  ;;  %v1052_v14 = vld [vmem:[%s1341_s0 + $0x18] sm:$0xff]  ;;  %v1066_v18 = vld [vmem:[%s1341_s0 + $0x28] sm:$0xff]  ;;  %vm320_vm5 = vcmask 1039360   ;;  %vm856_vm8 = vcmask 908288  }
   0x6   :  { %356 = vperm.xlu0 %913, %v895_v3   ;;  %403 = vperm.xlu1 %914, %v896_v4   ;;  %v1057_v15 = vld [vmem:[%s1341_s0 + $0x10] sm:$0xff]  ;;  %v1071_v19 = vld [vmem:[%s1341_s0 + $0x20] sm:$0xff]  ;;  %s952_s0 = smov 96  }
   0x7   :  { %v61_v44 = vld [vmem:[%s1342_s1] sm:$0xff]  ;;  %s953_s1 = smov 127  }
   0xa   :  { %85 = vperm.xlu0 %913, %v889_v5   ;;  %193 = vperm.xlu1 %914, %v891_v6  }
   0xe   :  { %129 = vperm.xlu0 %913, %v890_v7   ;;  %337 = vperm.xlu1 %914, %v894_v8  }
  0x7d   :  { %v213_v11 = vpop.permute.xlu0 %212  ;;  %v260_v29 = vpop.permute.xlu1 %259 }
  0x7e   :  { %v216_v12 = vmul.f32 %v213_v11, %v1040_v9  ;;  %v215_v13 = vmul.f32 %v213_v11, %v1045_v10  ;;  %v218_v16 = vmul.f32 %v213_v11, %v1052_v14  ;;  %v217_v17 = vmul.f32 %v213_v11, %v1057_v15 }
  0x7f   :  { %v220_v20 = vmul.f32 %v213_v11, %v1066_v18  ;;  %v219_v21 = vmul.f32 %v213_v11, %v1071_v19  ;;  %v263_v30 = vmul.f32 %v260_v29, %v1040_v9  ;;  %v262_v31 = vmul.f32 %v260_v29, %v1045_v10 }
  0x80   :  { %229 = vrot.lane.b32.xlu1 %v216_v12, %s951_s29  ;;  %227 = vrot.lane.b32.xlu0 %v215_v13, %s951_s29  ;;  %v265_v32 = vmul.f32 %v260_v29, %v1052_v14  ;;  %v264_v33 = vmul.f32 %v260_v29, %v1057_v15  ;;  %v267_v34 = vmul.f32 %v260_v29, %v1066_v18 }
  0x81   :  { %v357_v22 = vpop.permute.xlu0 %356  ;;  %v266_v35 = vmul.f32 %v260_v29, %v1071_v19  ;;  %v404_v36 = vpop.permute.xlu1 %403 }
  0x82   :  { %v360_v23 = vmul.f32 %v357_v22, %v1040_v9  ;;  %v359_v24 = vmul.f32 %v357_v22, %v1045_v10  ;;  %v362_v25 = vmul.f32 %v357_v22, %v1052_v14  ;;  %v361_v26 = vmul.f32 %v357_v22, %v1057_v15 }
  0x83   :  { %v364_v27 = vmul.f32 %v357_v22, %v1066_v18  ;;  %v363_v28 = vmul.f32 %v357_v22, %v1071_v19  ;;  %v407_v37 = vmul.f32 %v404_v36, %v1040_v9  ;;  %v406_v38 = vmul.f32 %v404_v36, %v1045_v10 }
  0x84   :  { %233 = vrot.lane.b32.xlu1 %v218_v16, %s951_s29  ;;  %231 = vrot.lane.b32.xlu0 %v217_v17, %s951_s29  ;;  %v409_v39 = vmul.f32 %v404_v36, %v1052_v14  ;;  %v408_v40 = vmul.f32 %v404_v36, %v1057_v15  ;;  %v411_v41 = vmul.f32 %v404_v36, %v1066_v18 }
  0x85   :  { %v410_v42 = vmul.f32 %v404_v36, %v1071_v19  ;;  %v86_v43 = vpop.permute.xlu0 %85  ;;  %v1142_v58 = vpop.permute.xlu1 %193 }
  0x86   :  { %v88_v45 = vmul.f32 %v86_v43, %v1045_v10  ;;  %v90_v46 = vmul.f32 %v86_v43, %v1057_v15  ;;  %v89_v47 = vmul.f32 %v86_v43, %v1040_v9  ;;  %v92_v48 = vmul.f32 %v86_v43, %v1071_v19 }
  0x87   :  { %v91_v49 = vmul.f32 %v86_v43, %v1052_v14  ;;  %v93_v52 = vmul.f32 %v86_v43, %v1066_v18  ;;  %v198_v13 = vmul.f32 %v1142_v58, %v1057_v15  ;;  %v196_v43 = vmul.f32 %v1142_v58, %v1045_v10 }
  0x88   :  { %237 = vrot.lane.b32.xlu1 %v220_v20, %s951_s29  ;;  %235 = vrot.lane.b32.xlu0 %v219_v21, %s951_s29  ;;  %v201_v21 = vmul.f32 %v1142_v58, %v1066_v18 }
  0x89   :  { %v130_v50 = vpop.permute.xlu0 %129  ;;  %v1144_v59 = vpop.permute.xlu1 %337 }
  0x8a   :  { %v132_v51 = vmul.f32 %v130_v50, %v1045_v10  ;;  %v134_v53 = vmul.f32 %v130_v50, %v1057_v15  ;;  %v133_v54 = vmul.f32 %v130_v50, %v1040_v9  ;;  %v136_v55 = vmul.f32 %v130_v50, %v1071_v19 }
  0x8b   :  { %v135_v56 = vmul.f32 %v130_v50, %v1052_v14  ;;  %v137_v57 = vmul.f32 %v130_v50, %v1066_v18 }
  0x8c   :  { %373 = vrot.lane.b32.xlu1 %v360_v23, %s951_s29  ;;  %371 = vrot.lane.b32.xlu0 %v359_v24, %s951_s29 }
  0x90   :  { %377 = vrot.lane.b32.xlu1 %v362_v25, %s951_s29  ;;  %375 = vrot.lane.b32.xlu0 %v361_v26, %s951_s29 }
  0x94   :  { %381 = vrot.lane.b32.xlu1 %v364_v27, %s951_s29  ;;  %379 = vrot.lane.b32.xlu0 %v363_v28, %s951_s29  ;;  %v197_v27 = vmul.f32 %v1142_v58, %v1040_v9 }
  0x98   :  { %276 = vrot.lane.b32.xlu1 %v263_v30, %s952_s0  ;;  %274 = vrot.lane.b32.xlu0 %v262_v31, %s952_s0 }
  0x9c   :  { %280 = vrot.lane.b32.xlu1 %v265_v32, %s952_s0  ;;  %278 = vrot.lane.b32.xlu0 %v264_v33, %s952_s0  ;;  %v199_v33 = vmul.f32 %v1142_v58, %v1052_v14 }
  0xa0   :  { %284 = vrot.lane.b32.xlu1 %v267_v34, %s952_s0  ;;  %282 = vrot.lane.b32.xlu0 %v266_v35, %s952_s0  ;;  %v342_v34 = vmul.f32 %v1144_v59, %v1057_v15 }
  0xa4   :  { %420 = vrot.lane.b32.xlu1 %v407_v37, %s952_s0  ;;  %418 = vrot.lane.b32.xlu0 %v406_v38, %s952_s0 }
  0xa8   :  { %424 = vrot.lane.b32.xlu1 %v409_v39, %s952_s0  ;;  %422 = vrot.lane.b32.xlu0 %v408_v40, %s952_s0 }
  0xac   :  { %428 = vrot.lane.b32.xlu1 %v411_v41, %s952_s0  ;;  %426 = vrot.lane.b32.xlu0 %v410_v42, %s952_s0 }
  0xb0   :  { %100 = vrot.lane.b32.xlu1 %v88_v45, %s951_s29  ;;  %64 = vperm.xlu0 %913, %v61_v44   ;;  %v341_v44 = vmul.f32 %v1144_v59, %v1040_v9 }
  0xb4   :  { %104 = vrot.lane.b32.xlu1 %v90_v46, %s951_s29  ;;  %102 = vrot.lane.b32.xlu0 %v89_v47, %s951_s29 }
  0xb8   :  { %108 = vrot.lane.b32.xlu1 %v92_v48, %s951_s29  ;;  %106 = vrot.lane.b32.xlu0 %v91_v49, %s951_s29 }
  0xbc   :  { %144 = vrot.lane.b32.xlu1 %v132_v51, %s952_s0  ;;  %110 = vrot.lane.b32.xlu0 %v93_v52, %s951_s29 }
  0xc0   :  { %148 = vrot.lane.b32.xlu1 %v134_v53, %s952_s0  ;;  %146 = vrot.lane.b32.xlu0 %v133_v54, %s952_s0 }
  0xc4   :  { %152 = vrot.lane.b32.xlu1 %v136_v55, %s952_s0  ;;  %150 = vrot.lane.b32.xlu0 %v135_v56, %s952_s0  ;;  %v200_v55 = vmul.f32 %v1142_v58, %v1071_v19  ;;  %v343_v56 = vmul.f32 %v1144_v59, %v1052_v14  ;;  %v340_v58 = vmul.f32 %v1144_v59, %v1045_v10 }
  0xc8   :  { %154 = vrot.lane.b32.xlu0 %v137_v57, %s952_s0 }
  0xf2   :  { %v230_v60 = vpop.permute.xlu1 %229  ;;  %v228_v61 = vpop.permute.xlu0 %227 }
  0xf3   :  { %v239_v40 = vsel %vm112_vm0, %v228_v61, %v230_v60 }
  0xf4   :  { %v249_v49 = vadd.f32 %v239_v40, %v196_v43 }
  0xf6   :  { %v234_v62 = vpop.permute.xlu1 %233  ;;  %v232_v63 = vpop.permute.xlu0 %231 }
  0xf7   :  { %v251_v16 = vadd.f32 %v232_v63, %v198_v13  ;;  %v240_v24 = vsel %vm112_vm0, %v230_v60, %v232_v63 }
  0xf8   :  { %v250_v30 = vadd.f32 %v240_v24, %v197_v27 }
  0xfa   :  { %v238_v0 = vpop.permute.xlu1 %237  ;;  %v236_v2 = vpop.permute.xlu0 %235 }
  0xfb   :  { %v254_v23 = vadd.f32 %v238_v0, %v201_v21  ;;  %v241_v31 = vsel %vm112_vm0, %v234_v62, %v236_v2  ;;  %v242_v51 = vsel %vm112_vm0, %v236_v2, %v238_v0  ;;  %v345_v2 = vmul.f32 %v1144_v59, %v1066_v18 }
  0xfc   :  { %v252_v38 = vadd.f32 %v241_v31, %v199_v33  ;;  %v253_v63 = vadd.f32 %v242_v51, %v200_v55 }
  0xfe   :  { %v1146_v3 = vpop.permute.xlu1 %373  ;;  %v1148_v4 = vpop.permute.xlu0 %371 }
  0xff   :  { %v383_v0 = vsel %vm112_vm0, %v1148_v4, %v1146_v3  ;;  %v344_v4 = vmul.f32 %v1144_v59, %v1071_v19 }
 0x102   :  { %v378_v5 = vpop.permute.xlu1 %377  ;;  %v376_v6 = vpop.permute.xlu0 %375 }
 0x103   :  { %v395_v39 = vadd.f32 %v376_v6, %v342_v34  ;;  %v384_v41 = vsel %vm112_vm0, %v1146_v3, %v376_v6 }
 0x104   :  { %v394_v50 = vadd.f32 %v384_v41, %v341_v44 }
 0x106   :  { %v1150_v7 = vpop.permute.xlu1 %381  ;;  %v1152_v8 = vpop.permute.xlu0 %379 }
 0x107   :  { %v385_v52 = vsel %vm112_vm0, %v378_v5, %v1152_v8  ;;  %v386_v3 = vsel %vm112_vm0, %v1152_v8, %v1150_v7 }
 0x108   :  { %v396_v6 = vadd.f32 %v385_v52, %v343_v56 }
 0x10a   :  { %v277_v11 = vpop.permute.xlu1 %276  ;;  %v275_v12 = vpop.permute.xlu0 %274 }
 0x10b   :  { %v286_v47 = vsel %vm156_vm1, %v275_v12, %v277_v11 }
 0x10c   :  { %v296_v57 = vadd.f32 %v286_v47, %v249_v49 }
 0x10e   :  { %v281_v17 = vpop.permute.xlu1 %280  ;;  %v279_v20 = vpop.permute.xlu0 %278 }
 0x10f   :  { %v298_v22 = vadd.f32 %v279_v20, %v251_v16  ;;  %v287_v29 = vsel %vm156_vm1, %v277_v11, %v279_v20  ;;  %v393_v16 = vadd.f32 %v383_v0, %v340_v58 }
 0x110   :  { %v297_v35 = vadd.f32 %v287_v29, %v250_v30 }
 0x111   :  { %312 = vrot.lane.b32.xlu1 %v298_v22, %s953_s1 }
 0x112   :  { %v285_v25 = vpop.permute.xlu1 %284  ;;  %v283_v26 = vpop.permute.xlu0 %282 }
 0x113   :  { %v301_v28 = vadd.f32 %v285_v25, %v254_v23  ;;  %v288_v36 = vsel %vm156_vm1, %v281_v17, %v283_v26  ;;  %v289_v61 = vsel %vm156_vm1, %v283_v26, %v285_v25  ;;  %v398_v17 = vadd.f32 %v1150_v7, %v345_v2 }
 0x114   :  { %v299_v45 = vadd.f32 %v288_v36, %v252_v38  ;;  %v300_v5 = vadd.f32 %v289_v61, %v253_v63  ;;  %v397_v23 = vadd.f32 %v386_v3, %v344_v4 }
 0x115   :  { %318 = vrot.lane.b32.xlu0 %v301_v28, %s953_s1 }
 0x116   :  { %v419_v32 = vpop.permute.xlu0 %418  ;;  %v421_v37 = vpop.permute.xlu1 %420 }
 0x117   :  { %v430_v12 = vsel %vm156_vm1, %v419_v32, %v421_v37  ;;  %v30_v32 = vlaneseq }
 0x118   :  { %v440_v20 = vadd.f32 %v430_v12, %v393_v16 }
 0x119   :  { %310 = vrot.lane.b32.xlu0 %v297_v35, %s953_s1  ;;  %v31_v35 = vand.u32 127, %v30_v32 }
 0x11a   :  { %v423_v42 = vpop.permute.xlu0 %422  ;;  %v425_v53 = vpop.permute.xlu1 %424 }
 0x11b   :  { %v442_v46 = vadd.f32 %v423_v42, %v395_v39  ;;  %v431_v48 = vsel %vm156_vm1, %v421_v37, %v423_v42  ;;  %v32_v38 = vadd.s32 128, %v31_v35  ;;  %v37_v42 = vand.u32 15, %v31_v35 }
 0x11c   :  { %v441_v60 = vadd.f32 %v431_v48, %v394_v50 }
 0x11d   :  { %468 = vrot.lane.b32.xlu1 %v442_v46, %s954_s14  ;;  %314 = vrot.lane.b32.xlu0 %v299_v45, %s953_s1  ;;  %v44_v41 = vand.u32 15, %v32_v38  ;;  %v169_v46 = vadd.s32 4294967295, %v37_v42  ;;  %v446_v63 = vadd.s32 1, %v37_v42 }
 0x11e   :  { %v427_v54 = vpop.permute.xlu0 %426  ;;  %v429_v13 = vpop.permute.xlu1 %428 }
 0x11f   :  { %v432_v62 = vsel %vm156_vm1, %v425_v53, %v427_v54  ;;  %v445_v21 = vadd.f32 %v429_v13, %v398_v17  ;;  %v433_v22 = vsel %vm156_vm1, %v427_v54, %v429_v13  ;;  %v170_v43 = vadd.s32 4294967295, %v44_v41 }
 0x120   :  { %v443_v11 = vadd.f32 %v432_v62, %v396_v6  ;;  %v444_v24 = vadd.f32 %v433_v22, %v397_v23  ;;  %vm171_vm3 = vcmp.ge.s32.totalorder %v169_v46, 0  ;;  %v447_v55 = vadd.s32 1, %v44_v41 }
 0x121   :  { %308 = vrot.lane.b32.xlu1 %v296_v57, %s953_s1  ;;  %466 = vrot.lane.b32.xlu0 %v441_v60, %s954_s14  ;;  %vm172_vm2 = vcmp.ge.s32.totalorder %v170_v43, 0  ;;  %vm450_vm7 = vcmp.lt.s32.totalorder %v446_v63, 16 }
 0x122   :  { %v101_v27 = vpop.permute.xlu1 %100  ;;  %vm451_vm6 = vcmp.lt.s32.totalorder %v447_v55, 16 }
 0x125   :  { %316 = vrot.lane.b32.xlu1 %v300_v5, %s953_s1  ;;  %470 = vrot.lane.b32.xlu0 %v443_v11, %s954_s14 }
 0x126   :  { %v105_v7 = vpop.permute.xlu1 %104 }
 0x129   :  { %464 = vrot.lane.b32.xlu1 %v440_v20, %s954_s14  ;;  %474 = vrot.lane.b32.xlu0 %v445_v21, %s954_s14 }
 0x12a   :  { %v109_v29 = vpop.permute.xlu1 %108 }
 0x12b   :  { %v65_v25 = vpop.permute.xlu0 %64 }
 0x12c   :  { %v67_v49 = vmul.f32 %v1045_v10, %v65_v25  ;;  %v68_v50 = vmul.f32 %v1040_v9, %v65_v25  ;;  %v69_v61 = vmul.f32 %v1052_v14, %v65_v25  ;;  %v70_v6 = vmul.f32 %v1071_v19, %v65_v25 }
 0x12d   :  { %472 = vrot.lane.b32.xlu1 %v444_v24, %s954_s14 }
 0x12e   :  { %v145_v30 = vpop.permute.xlu1 %144 }
 0x12f   :  { %v103_v26 = vpop.permute.xlu0 %102 }
 0x130   :  { %v113_v47 = vsel %vm112_vm0, %v101_v27, %v103_v26  ;;  %v114_v48 = vsel %vm112_vm0, %v103_v26, %v105_v7 }
 0x131   :  { %v121_v56 = vadd.f32 %v113_v47, %v67_v49  ;;  %v122_v57 = vadd.f32 %v114_v48, %v68_v50 }
 0x132   :  { %v149_v33 = vpop.permute.xlu1 %148 }
 0x133   :  { %v107_v28 = vpop.permute.xlu0 %106 }
 0x134   :  { %v115_v60 = vsel %vm112_vm0, %v107_v28, %v109_v29 }
 0x135   :  { %v123_v11 = vadd.f32 %v115_v60, %v69_v61 }
 0x136   :  { %v153_v36 = vpop.permute.xlu1 %152 }
 0x137   :  { %v111_v8 = vpop.permute.xlu0 %110 }
 0x138   :  { %v116_v62 = vsel %vm112_vm0, %v109_v29, %v111_v8 }
 0x139   :  { %v124_v16 = vadd.f32 %v116_v62, %v70_v6  ;;  %v547_v62 = vld [vmem:[%s1343_s2] sm:$0xff] }
 0x13b   :  { %v147_v59 = vpop.permute.xlu0 %146 }
 0x13c   :  { %v157_v53 = vsel %vm156_vm1, %v145_v30, %v147_v59  ;;  %v158_v54 = vsel %vm156_vm1, %v147_v59, %v149_v33 }
 0x13d   :  { %v165_v0 = vadd.f32 %v157_v53, %v121_v56  ;;  %v166_v58 = vadd.f32 %v158_v54, %v122_v57 }
 0x13f   :  { %v151_v31 = vpop.permute.xlu0 %150  ;;  %v182_v22 = vsel %vm172_vm2, %v166_v58, 0.0  ;;  %v181_v23 = vsel %vm171_vm3, %v165_v0, 0.0 }
 0x140   :  { %v159_v2 = vsel %vm156_vm1, %v151_v31, %v153_v36 }
 0x141   :  { %v167_v20 = vadd.f32 %v159_v2, %v123_v11 }
 0x143   :  { %v155_v34 = vpop.permute.xlu0 %154  ;;  %v183_v30 = vsel %vm171_vm3, %v167_v20, 0.0  ;;  %v957_v20 = vmov 4  }
 0x144   :  { %v160_v12 = vsel %vm156_vm1, %v153_v36, %v155_v34 }
 0x145   :  { %v168_v21 = vadd.f32 %v160_v12, %v124_v16 }
 0x147   :  { %v184_v33 = vsel %vm172_vm2, %v168_v21, 0.0  ;;  %v958_v21 = vmov 3  }
 0x183   :  { %v313_v39 = vpop.permute.xlu1 %312 }
 0x187   :  { %v319_v37 = vpop.permute.xlu0 %318 }
 0x18b   :  { %v311_v40 = vpop.permute.xlu0 %310 }
 0x18c   :  { %v322_v17 = vsel %vm320_vm5, %v311_v40, %v313_v39 }
 0x18d   :  { %v330_v26 = vadd.f32 %v322_v17, %v182_v22  ;;  %v959_v22 = vmov 7  }
 0x18f   :  { %v469_v44 = vpop.permute.xlu1 %468  ;;  %v315_v45 = vpop.permute.xlu0 %314 }
 0x193   :  { %v309_v51 = vpop.permute.xlu1 %308  ;;  %v467_v52 = vpop.permute.xlu0 %466 }
 0x194   :  { %v478_v13 = vsel %vm476_vm4, %v467_v52, %v469_v44  ;;  %v321_v3 = vsel %vm320_vm5, %v309_v51, %v311_v40 }
 0x195   :  { %v486_v24 = vsel %vm451_vm6, %v478_v13, 0.0  ;;  %v329_v27 = vadd.f32 %v321_v3, %v181_v23  ;;  %v494_v13 = vld [vmem:[%s1346_s5] sm:$0xff]  ;;  %v955_v3 = vmov 1   ;;  %v960_v23 = vmov 5   ;;  %s962_s5 = smov 111  }
 0x196   :  { %v1236_v59 = vadd.f32 %v486_v24, %v330_v26  ;;  %v961_v24 = vmov 6  }
 0x197   :  { %v317_v5 = vpop.permute.xlu1 %316  ;;  %v471_v4 = vpop.permute.xlu0 %470 }
 0x198   :  { %v323_v28 = vsel %vm320_vm5, %v315_v45, %v317_v5  ;;  %v324_v8 = vsel %vm320_vm5, %v317_v5, %v319_v37  ;;  %v493_v5 = vld [vmem:[%s1345_s4] sm:$0xff] }
 0x199   :  { %v331_v34 = vadd.f32 %v323_v28, %v183_v30  ;;  %v332_v38 = vadd.f32 %v324_v8, %v184_v33 }
 0x19b   :  { %v465_v25 = vpop.permute.xlu1 %464  ;;  %v475_v35 = vpop.permute.xlu0 %474 }
 0x19c   :  { %v477_v7 = vsel %vm476_vm4, %v465_v25, %v467_v52  ;;  %v549_v25 = vshrl.u32 %v30_v32, 7 }
 0x19d   :  { %v485_v29 = vsel %vm450_vm7, %v477_v7, 0.0 }
 0x19e   :  { %v1239_v31 = vadd.f32 %v485_v29, %v329_v27  ;;  %v550_v33 = vsub.s32 0, %v549_v25 }
 0x19f   :  { %v473_v36 = vpop.permute.xlu1 %472 }
 0x1a0   :  { %v479_v39 = vsel %vm476_vm4, %v471_v4, %v473_v36  ;;  %v480_v40 = vsel %vm476_vm4, %v473_v36, %v475_v35  ;;  %v495_v37 = vadd.f32 %v1236_v59, %v1239_v31  ;;  %v956_v4 = vmov 2  }
 0x1a1   :  { %v487_v41 = vsel %vm450_vm7, %v479_v39, 0.0  ;;  %v488_v42 = vsel %vm451_vm6, %v480_v40, 0.0  ;;  %v579_v39 = vsub.s32 1, %v549_v25 }
 0x1a2   :  { %v1248_v44 = vadd.f32 %v487_v41, %v331_v34  ;;  %v1250_v45 = vadd.f32 %v488_v42, %v332_v38  ;;  %496 = vadd.xlane.f32.xlu1 %v495_v37  ;;  %v663_v37 = vsub.s32 4, %v549_v25  ;;  %v635_v41 = vsub.s32 3, %v549_v25 }
 0x1a4   :  { %v498_v43 = vadd.f32 %v1250_v45, %v1248_v44 }
 0x1a6   :  { %499 = vadd.xlane.f32.xlu0 %v498_v43 }
 0x22b   :  { %v497_v46 = vpop.xlane.xlu1 %496 }
 0x22f   :  { %v500_v47 = vpop.xlane.xlu0 %499 }
 0x230   :  { %v501_v48 = vadd.f32 %v500_v47, %v497_v46 }
 0x232   :  { %v503_v49 = vmul.f32 0.001953125, %v501_v48 }
 0x234   :  { %v506_v50 = vsub.f32 %v1248_v44, %v503_v49  ;;  %v507_v51 = vsub.f32 %v1250_v45, %v503_v49  ;;  %v504_v52 = vsub.f32 %v1239_v31, %v503_v49  ;;  %v505_v53 = vsub.f32 %v1236_v59, %v503_v49 }
 0x236   :  { %v510_v54 = vmul.f32 %v506_v50, %v506_v50  ;;  %v511_v55 = vmul.f32 %v507_v51, %v507_v51  ;;  %v508_v56 = vmul.f32 %v504_v52, %v504_v52  ;;  %v509_v57 = vmul.f32 %v505_v53, %v505_v53 }
 0x238   :  { %v515_v60 = vadd.f32 %v511_v55, %v510_v54  ;;  %v512_v61 = vadd.f32 %v509_v57, %v508_v56 }
 0x23a   :  { %516 = vadd.xlane.f32.xlu1 %v515_v60  ;;  %513 = vadd.xlane.f32.xlu0 %v512_v61 }
 0x24b   :  { %566 = vperm.xlu1 %914, %v547_v62  }
 0x2c3   :  { %v517_v63 = vpop.xlane.xlu1 %516  ;;  %v514_v6 = vpop.xlane.xlu0 %513 }
 0x2c4   :  { %v518_v0 = vadd.f32 %v517_v63, %v514_v6 }
 0x2c6   :  { %v519_v58 = vmul.f32 0.001953125, %v518_v0 }
 0x2c7   :  { %v567_v26 = vpop.permute.xlu1 %566 }
 0x2c8   :  { %v520_v2 = vadd.f32 1e-05, %v519_v58 }
 0x2ca   :  { %924 = vrsqrt.f32 %v520_v2 }
 0x2d7   :  { %v925_v11 = vpop.eup %924 }
 0x2d8   :  { %v522_v12 = vmul.f32 %v925_v11, %v493_v5 }
 0x2da   :  { %527 = vperm.xlu0 %913, %v522_v12   ;;  %v523_v16 = vmul.f32 %v522_v12, %v503_v49 }
 0x2dc   :  { %v524_v17 = vsub.f32 %v494_v13, %v523_v16 }
 0x2de   :  { %915 = vset.pattern.permute.xlu0 %v955_v3  ;;  %536 = vperm.xlu1 %914, %v524_v17  }
 0x2df   :  { %594 = vperm.xlu0 %915, %v547_v62  }
 0x2e2   :  { %916 = vset.pattern.permute.xlu1 %v956_v4 }
 0x2e3   :  { %918 = vset.pattern.permute.xlu0 %v957_v20  ;;  %622 = vperm.xlu1 %916, %v547_v62  }
 0x2e4   :  { %678 = vperm.xlu0 %918, %v547_v62  }
 0x2e7   :  { %917 = vset.pattern.permute.xlu1 %v958_v21 }
 0x2e8   :  { %921 = vset.pattern.permute.xlu0 %v959_v22  ;;  %650 = vperm.xlu1 %917, %v547_v62  }
 0x2e9   :  { %762 = vperm.xlu0 %921, %v547_v62  }
 0x2ec   :  { %919 = vset.pattern.permute.xlu1 %v960_v23 }
 0x2ed   :  { %706 = vperm.xlu1 %919, %v547_v62   ;;  %923 = vset.pattern.permute.xlu0 %v950_v1 }
 0x2f1   :  { %920 = vset.pattern.permute.xlu1 %v961_v24  ;;  %v747_v24 = vsub.s32 7, %v549_v25 }
 0x2f2   :  { %734 = vperm.xlu1 %920, %v547_v62  }
 0x2f6   :  { %922 = vset.pattern.permute.xlu1 %v950_v1 }
 0x355   :  { %v528_v27 = vpop.permute.xlu0 %527 }
 0x356   :  { %v530_v28 = vmul.f32 %v528_v27, %v1239_v31  ;;  %v531_v7 = vmul.f32 %v528_v27, %v1236_v59  ;;  %v532_v8 = vmul.f32 %v528_v27, %v1248_v44  ;;  %v533_v29 = vmul.f32 %v528_v27, %v1250_v45 }
 0x357   :  { %v607_v59 = vsub.s32 2, %v549_v25  ;;  %v719_v27 = vsub.s32 6, %v549_v25 }
 0x359   :  { %v537_v30 = vpop.permute.xlu1 %536 }
 0x35a   :  { %v539_v34 = vadd.f32 %v537_v30, %v530_v28  ;;  %v540_v35 = vadd.f32 %v537_v30, %v531_v7  ;;  %v541_v36 = vadd.f32 %v537_v30, %v532_v8  ;;  %v542_v38 = vadd.f32 %v537_v30, %v533_v29  ;;  %v595_v51 = vpop.permute.xlu0 %594 }
 0x35c   :  { %v1274_v1 = vmax.f32 %v539_v34, 0.0  ;;  %v1276_v32 = vmax.f32 %v540_v35, 0.0  ;;  %v1278_v40 = vmax.f32 %v541_v36, 0.0  ;;  %v1280_v31 = vmax.f32 %v542_v38, 0.0 }
 0x35e   :  { %v551_v42 = vrot.slane %v1274_v1, %v550_v33  ;;  %v555_v44 = vrot.slane %v1276_v32, %v550_v33  ;;  %v559_v45 = vrot.slane %v1278_v40, %v550_v33  ;;  %v563_v43 = vrot.slane %v1280_v31, %v550_v33  ;;  %v623_v46 = vpop.permute.xlu1 %622 }
 0x35f   :  { %v580_v47 = vrot.slane %v1274_v1, %v579_v39  ;;  %v584_v48 = vrot.slane %v1276_v32, %v579_v39  ;;  %v588_v49 = vrot.slane %v1278_v40, %v579_v39  ;;  %v592_v50 = vrot.slane %v1280_v31, %v579_v39  ;;  %v679_v23 = vpop.permute.xlu0 %678 }
 0x360   :  { %v569_v52 = vmul.f32 %v567_v26, %v551_v42  ;;  %v570_v53 = vmul.f32 %v567_v26, %v555_v44  ;;  %v571_v54 = vmul.f32 %v567_v26, %v559_v45  ;;  %v572_v55 = vmul.f32 %v567_v26, %v563_v43 }
 0x361   :  { %v597_v56 = vmul.f32 %v595_v51, %v580_v47  ;;  %v598_v57 = vmul.f32 %v595_v51, %v584_v48  ;;  %v599_v60 = vmul.f32 %v595_v51, %v588_v49  ;;  %v600_v61 = vmul.f32 %v595_v51, %v592_v50 }
 0x362   :  { %v608_v62 = vrot.slane %v1274_v1, %v607_v59  ;;  %v612_v63 = vrot.slane %v1276_v32, %v607_v59  ;;  %v616_v6 = vrot.slane %v1278_v40, %v607_v59  ;;  %v620_v0 = vrot.slane %v1280_v31, %v607_v59 }
 0x363   :  { %v601_v58 = vadd.f32 %v597_v56, %v569_v52  ;;  %v602_v2 = vadd.f32 %v598_v57, %v570_v53  ;;  %v603_v5 = vadd.f32 %v599_v60, %v571_v54  ;;  %v604_v11 = vadd.f32 %v600_v61, %v572_v55  ;;  %v651_v12 = vpop.permute.xlu1 %650 }
 0x364   :  { %v625_v13 = vmul.f32 %v623_v46, %v608_v62  ;;  %v626_v16 = vmul.f32 %v623_v46, %v612_v63  ;;  %v627_v17 = vmul.f32 %v623_v46, %v616_v6  ;;  %v628_v3 = vmul.f32 %v623_v46, %v620_v0 }
 0x365   :  { %v664_v4 = vrot.slane %v1274_v1, %v663_v37  ;;  %v668_v20 = vrot.slane %v1276_v32, %v663_v37  ;;  %v672_v21 = vrot.slane %v1278_v40, %v663_v37  ;;  %v676_v22 = vrot.slane %v1280_v31, %v663_v37 }
 0x366   :  { %v691_v26 = vsub.s32 5, %v549_v25  ;;  %v629_v28 = vadd.f32 %v625_v13, %v601_v58  ;;  %v630_v7 = vadd.f32 %v626_v16, %v602_v2  ;;  %v631_v8 = vadd.f32 %v627_v17, %v603_v5  ;;  %v763_v2 = vpop.permute.xlu0 %762 }
 0x367   :  { %v632_v29 = vadd.f32 %v628_v3, %v604_v11  ;;  %v636_v30 = vrot.slane %v1274_v1, %v635_v41  ;;  %v640_v33 = vrot.slane %v1276_v32, %v635_v41  ;;  %v644_v34 = vrot.slane %v1278_v40, %v635_v41 }
 0x368   :  { %v648_v35 = vrot.slane %v1280_v31, %v635_v41  ;;  %v681_v36 = vmul.f32 %v679_v23, %v664_v4  ;;  %v682_v38 = vmul.f32 %v679_v23, %v668_v20  ;;  %v683_v39 = vmul.f32 %v679_v23, %v672_v21  ;;  %v707_v37 = vpop.permute.xlu1 %706 }
 0x369   :  { %v684_v59 = vmul.f32 %v679_v23, %v676_v22  ;;  %v653_v42 = vmul.f32 %v651_v12, %v636_v30  ;;  %v654_v44 = vmul.f32 %v651_v12, %v640_v33  ;;  %v655_v25 = vmul.f32 %v651_v12, %v644_v34 }
 0x36a   :  { %v656_v45 = vmul.f32 %v651_v12, %v648_v35  ;;  %v748_v43 = vrot.slane %v1274_v1, %v747_v24  ;;  %v752_v46 = vrot.slane %v1276_v32, %v747_v24  ;;  %v756_v47 = vrot.slane %v1278_v40, %v747_v24 }
 0x36b   :  { %v760_v48 = vrot.slane %v1280_v31, %v747_v24  ;;  %v657_v49 = vadd.f32 %v653_v42, %v629_v28  ;;  %v658_v50 = vadd.f32 %v654_v44, %v630_v7  ;;  %v659_v41 = vadd.f32 %v655_v25, %v631_v8 }
 0x36c   :  { %v660_v51 = vadd.f32 %v656_v45, %v632_v29  ;;  %v692_v52 = vrot.slane %v1274_v1, %v691_v26  ;;  %v696_v53 = vrot.slane %v1276_v32, %v691_v26  ;;  %v700_v54 = vrot.slane %v1278_v40, %v691_v26 }
 0x36d   :  { %v704_v55 = vrot.slane %v1280_v31, %v691_v26  ;;  %v685_v56 = vadd.f32 %v681_v36, %v657_v49  ;;  %v686_v57 = vadd.f32 %v682_v38, %v658_v50  ;;  %v687_v60 = vadd.f32 %v683_v39, %v659_v41  ;;  %v735_v58 = vpop.permute.xlu1 %734  ;;  %v826_v49 = vld [vmem:[%s1344_s3] sm:$0xff] }
 0x36e   :  { %v688_v61 = vadd.f32 %v684_v59, %v660_v51  ;;  %v709_v62 = vmul.f32 %v707_v37, %v692_v52  ;;  %v710_v63 = vmul.f32 %v707_v37, %v696_v53  ;;  %v711_v6 = vmul.f32 %v707_v37, %v700_v54 }
 0x36f   :  { %v712_v0 = vmul.f32 %v707_v37, %v704_v55  ;;  %v720_v5 = vrot.slane %v1274_v1, %v719_v27  ;;  %v724_v11 = vrot.slane %v1276_v32, %v719_v27  ;;  %v728_v12 = vrot.slane %v1278_v40, %v719_v27 }
 0x370   :  { %v732_v13 = vrot.slane %v1280_v31, %v719_v27  ;;  %v713_v16 = vadd.f32 %v709_v62, %v685_v56  ;;  %v714_v17 = vadd.f32 %v710_v63, %v686_v57  ;;  %v715_v3 = vadd.f32 %v711_v6, %v687_v60 }
 0x371   :  { %v716_v4 = vadd.f32 %v712_v0, %v688_v61  ;;  %v737_v20 = vmul.f32 %v735_v58, %v720_v5  ;;  %v738_v21 = vmul.f32 %v735_v58, %v724_v11  ;;  %v739_v22 = vmul.f32 %v735_v58, %v728_v12  ;;  %v773_v61 = vld [vmem:[%s1347_s6] sm:$0xff]  ;;  %s963_s6 = smov [#allocation2]  }
 0x372   :  { %v740_v23 = vmul.f32 %v735_v58, %v732_v13  ;;  %v765_v24 = vmul.f32 %v763_v2, %v748_v43  ;;  %v766_v26 = vmul.f32 %v763_v2, %v752_v46  ;;  %v767_v28 = vmul.f32 %v763_v2, %v756_v47 }
 0x373   :  { %v768_v7 = vmul.f32 %v763_v2, %v760_v48  ;;  %v741_v8 = vadd.f32 %v737_v20, %v713_v16  ;;  %v742_v1 = vadd.f32 %v738_v21, %v714_v17  ;;  %v743_v29 = vadd.f32 %v739_v22, %v715_v3 }
 0x374   :  { %v744_v32 = vadd.f32 %v740_v23, %v716_v4 }
 0x375   :  { %v771_v30 = vadd.f32 %v767_v28, %v743_v29  ;;  %v769_v31 = vadd.f32 %v765_v24, %v741_v8  ;;  %v770_v27 = vadd.f32 %v766_v26, %v742_v1 }
 0x376   :  { %v1314_v40 = vadd.f32 %v768_v7, %v744_v32 }
 0x377   :  { %v775_v34 = vadd.f32 %v770_v27, %v769_v31 }
 0x378   :  { %v778_v33 = vadd.f32 %v1314_v40, %v771_v30 }
 0x379   :  { %776 = vadd.xlane.f32.xlu1 %v775_v34 }
 0x37a   :  { %779 = vadd.xlane.f32.xlu0 %v778_v33 }
 0x402   :  { %v777_v36 = vpop.xlane.xlu1 %776 }
 0x403   :  { %v780_v35 = vpop.xlane.xlu0 %779 }
 0x404   :  { %v781_v38 = vadd.f32 %v780_v35, %v777_v36 }
 0x406   :  { %v782_v39 = vmul.f32 0.001953125, %v781_v38 }
 0x408   :  { %v785_v59 = vsub.f32 %v771_v30, %v782_v39  ;;  %v786_v37 = vsub.f32 %v1314_v40, %v782_v39  ;;  %v783_v42 = vsub.f32 %v769_v31, %v782_v39  ;;  %v784_v44 = vsub.f32 %v770_v27, %v782_v39 }
 0x40a   :  { %v789_v25 = vmul.f32 %v785_v59, %v785_v59  ;;  %v790_v45 = vmul.f32 %v786_v37, %v786_v37  ;;  %v787_v43 = vmul.f32 %v783_v42, %v783_v42  ;;  %v788_v46 = vmul.f32 %v784_v44, %v784_v44 }
 0x40c   :  { %v794_v47 = vadd.f32 %v790_v45, %v789_v25  ;;  %v791_v48 = vadd.f32 %v788_v46, %v787_v43 }
 0x40e   :  { %795 = vadd.xlane.f32.xlu0 %v794_v47  ;;  %792 = vadd.xlane.f32.xlu1 %v791_v48 }
 0x41f   :  { %829 = vperm.xlu1 %922, %v826_v49  }
 0x497   :  { %v796_v50 = vpop.xlane.xlu0 %795  ;;  %v793_v41 = vpop.xlane.xlu1 %792 }
 0x498   :  { %v797_v51 = vadd.f32 %v796_v50, %v793_v41 }
 0x49a   :  { %v798_v52 = vmul.f32 0.001953125, %v797_v51 }
 0x49b   :  { %v830_v53 = vpop.permute.xlu1 %829 }
 0x49c   :  { %v799_v54 = vadd.f32 1e-05, %v798_v52  ;;  %v832_v55 = vmul.f32 %v830_v53, %v1045_v10  ;;  %v833_v56 = vmul.f32 %v830_v53, %v1040_v9  ;;  %v834_v57 = vmul.f32 %v830_v53, %v1057_v15  ;;  %v774_v10 = vld [vmem:[%s1348_s7] sm:$0xff]  ;;  %s878_s7 = sshll.u32 %s963_s6, 4  ;;  %s879_s7 = int_to_ptr.vmem [resolvable:$true] %s878_s7 }
 0x49d   :  { %v835_v60 = vmul.f32 %v830_v53, %v1052_v14  ;;  %v836_v15 = vmul.f32 %v830_v53, %v1071_v19  ;;  %v837_v14 = vmul.f32 %v830_v53, %v1066_v18  ;;  %s928_s24 = scalar_lea.vmem %s879_s7, 512  ;;  %p933_p1 = scmp.lt.s32.totalorder %s879_s7, %s879_s7 }
 0x49e   :  { %926 = vrsqrt.f32 %v799_v54  ;;  %844 = vrot.lane.b32.xlu1 %v832_v55, %s962_s5  ;;  %p929_p0 = scmp.ne.s32.totalorder %s879_s7, %s928_s24  ;;  %p934_p2 = scmp.lt.s32.totalorder %s928_s24, %s928_s24 }
 0x4a0   :  { %p935_p3 = por %p934_p2, %p933_p1 }
 0x4a2   :  { %846 = vrot.lane.b32.xlu1 %v833_v56, %s962_s5  ;;  %p936_p4 = pnand %p935_p3, %p929_p0 }
 0x4a6   :  { %848 = vrot.lane.b32.xlu1 %v834_v57, %s962_s5 }
 0x4aa   :  { %850 = vrot.lane.b32.xlu1 %v835_v60, %s962_s5 }
 0x4ab   :  { %v927_v62 = vpop.eup %926 }
 0x4ac   :  { %v801_v63 = vmul.f32 %v927_v62, %v773_v61 }
 0x4ae   :  { %806 = vperm.xlu0 %923, %v801_v63   ;;  %v802_v6 = vmul.f32 %v801_v63, %v782_v39 }
 0x4b0   :  { %v803_v9 = vsub.f32 %v774_v10, %v802_v6 }
 0x4b2   :  { %815 = vperm.xlu1 %922, %v803_v9  }
 0x4b6   :  { %852 = vrot.lane.b32.xlu1 %v836_v15, %s962_s5 }
 0x4ba   :  { %854 = vrot.lane.b32.xlu1 %v837_v14, %s962_s5 }
 0x510   :  { %v845_v0 = vpop.permute.xlu1 %844 }
 0x514   :  { %v847_v58 = vpop.permute.xlu1 %846 }
 0x515   :  { %v857_v18 = vsel %vm856_vm8, %v845_v0, %v847_v58 }
 0x518   :  { %v849_v2 = vpop.permute.xlu1 %848 }
 0x519   :  { %v858_v24 = vsel %vm856_vm8, %v847_v58, %v849_v2 }
 0x51c   :  { %v851_v5 = vpop.permute.xlu1 %850 }
 0x529   :  { %v807_v11 = vpop.permute.xlu0 %806 }
 0x52a   :  { %v809_v12 = vmul.f32 %v807_v11, %v769_v31  ;;  %v810_v13 = vmul.f32 %v807_v11, %v770_v27  ;;  %v811_v16 = vmul.f32 %v807_v11, %v771_v30  ;;  %v812_v21 = vmul.f32 %v807_v11, %v1314_v40 }
 0x52d   :  { %v816_v17 = vpop.permute.xlu1 %815 }
 0x52e   :  { %v818_v3 = vadd.f32 %v816_v17, %v809_v12  ;;  %v819_v4 = vadd.f32 %v816_v17, %v810_v13  ;;  %v820_v20 = vadd.f32 %v816_v17, %v811_v16  ;;  %v821_v28 = vadd.f32 %v816_v17, %v812_v21 }
 0x530   :  { %v822_v19 = vmax.f32 %v818_v3, 0.0  ;;  %v823_v22 = vmax.f32 %v819_v4, 0.0  ;;  %v824_v23 = vmax.f32 %v820_v20, 0.0  ;;  %v825_v32 = vmax.f32 %v821_v28, 0.0 }
 0x531   :  { %v853_v26 = vpop.permute.xlu1 %852 }
 0x532   :  { %v865_v7 = vadd.f32 %v857_v18, %v822_v19  ;;  %v866_v8 = vadd.f32 %v858_v24, %v823_v22  ;;  %v859_v1 = vsel %vm856_vm8, %v851_v5, %v853_v26 }
 0x533   :  { %v867_v29 = vadd.f32 %v859_v1, %v824_v23 }
 0x534   :  { %869 = vst [vmem:[#allocation2] sm:$0xff] %v865_v7  ;;  %870 = vst [vmem:[#allocation2 + $0x8] sm:$0xff] %v866_v8 }
 0x535   :  { %871 = vst [vmem:[#allocation2 + $0x10] sm:$0xff] %v867_v29  ;;  %v855_v30 = vpop.permute.xlu1 %854 }
 0x536   :  { %v860_v40 = vsel %vm856_vm8, %v853_v26, %v855_v30 }
 0x537   :  { %v868_v31 = vadd.f32 %v860_v40, %v825_v32 }
 0x539   :  { %872 = vst [vmem:[#allocation2 + $0x18] sm:$0xff] %v868_v31 }
 0x53a   :  { %939 = shalt.err (!%p936_p4)
}
 0x53b   :  { %s964_s25 = smov 256   ;;  %s965_s26 = smov 16  }
 0x53c   :  { %884 = dma.vmem_to_hbm [thread:$0]  %s879_s7, 512, %s1349_s8, [#allocation3], %s964_s25, %s964_s25, %s965_s26  }
 0x53d   :  { %948 = dma.done.wait [#allocation3], 512  }
 0x53e   :  { %949 = vsyncadd [#allocation3], 4294966784 }
 0x53f   :  { %888 = vsyncpa [#allocation3], 1 }

</bundles_post_ra>
